<compile_context>
chip_gen: v6e
topology: v6e:2x2x1
jax: 0.10.0
libtpu: 0.0.40
codegen_flags: <defaults>
</compile_context>

<pallas_src>
import jax
import jax.numpy as jnp
from jax import lax
from jax.experimental import pallas as pl
from jax.experimental.pallas import tpu as pltpu

_LANES = 128
_CHUNK_SUBLANES = 8         # 8 sublanes x 128 lanes = 1 f32 vreg per matrix entry
_MAX_BLOCK_SUBLANES = 128   # up to (9, 128, 128) f32 per grid step (~576 KiB / buffer)
_TOTAL_ITERS = 6            # scaled Newton reaches fp32 accuracy in ~5-6 steps
_SCALED_ITERS = 3           # determinant scaling only while far from convergence


def _svd_rotation_kernel(x_ref, o_ref):
    # x_ref / o_ref block: (9, block_sublanes, 128)
    #   axis 0 : row-major 3x3 entry index [a00,a01,a02,a10,...,a22]
    #   axes 1-2 : batch spread over sublanes x lanes (full vregs per operand)
    num_chunks = x_ref.shape[1] // _CHUNK_SUBLANES

    def chunk_body(c, carry):
        s = pl.multiple_of(c * _CHUNK_SUBLANES, _CHUNK_SUBLANES)
        X = [x_ref[i, pl.ds(s, _CHUNK_SUBLANES), :].astype(jnp.float32)
             for i in range(9)]

        for it in range(_TOTAL_ITERS):
            x00, x01, x02, x10, x11, x12, x20, x21, x22 = X
            # Cofactor matrix C of X  ->  inv(X)^T = C / det(X)
            c00 = x11 * x22 - x12 * x21
            c01 = x12 * x20 - x10 * x22
            c02 = x10 * x21 - x11 * x20
            c10 = x02 * x21 - x01 * x22
            c11 = x00 * x22 - x02 * x20
            c12 = x01 * x20 - x00 * x21
            c20 = x01 * x12 - x02 * x11
            c21 = x02 * x10 - x00 * x12
            c22 = x00 * x11 - x01 * x10
            cof = (c00, c01, c02, c10, c11, c12, c20, c21, c22)

            det = x00 * c00 + x01 * c01 + x02 * c02

            if it < _SCALED_ITERS:
                # Determinant scaling g = |det|^(-1/3); (1/g)/det == sign(det)*g^2,
                # so only one log + one exp on the EUP and no reciprocal at all.
                abs_det = jnp.maximum(jnp.abs(det), 1e-30)   # singular-iterate guard
                g = jnp.exp(jnp.log(abs_det) * (-1.0 / 3.0))
                gg = g * g
                scale = jnp.where(det < 0.0, -gg, gg)
                half_g = 0.5 * g                              # fold the 0.5 once
                half_scale = 0.5 * scale
                X = [half_g * xi + half_scale * ci for xi, ci in zip(X, cof)]
            else:
                # Near convergence det ~= +-1: no guard needed; approx reciprocal
                # (EUP slot) plus one Newton-Raphson refinement replaces the long
                # exact-divide VALU sequence.
                r = pl.reciprocal(det, approx=True)
                r = r * (2.0 - det * r)
                X = [0.5 * (xi + r * ci) for xi, ci in zip(X, cof)]

        # Lane-dense unmasked stores, one (8, 128) slab per matrix entry.
        for i in range(9):
            o_ref[i, pl.ds(s, _CHUNK_SUBLANES), :] = X[i].astype(o_ref.dtype)
        return carry

    lax.fori_loop(0, num_chunks, chunk_body, 0)


def _svd_rotation_forward(module_input):
    """module_input: (B, 3, 3) -> (B, 3, 3) closest rotations (U @ V^T)."""
    B = module_input.shape[0]
    dtype = module_input.dtype
    # TODO(synk): if bf16 inputs are ever used, keep the output in f32 (bf16 eps
    # ~8e-3 exceeds the ~1e-3 orthogonality tolerance the module implies).

    # --- block / grid sizing -------------------------------------------------
    b_rows_needed = max(1, -(-B // _LANES))            # rows of 128 batch elems
    half_rows = -(-b_rows_needed // 2)                 # keep >=2 steps for v7x TCs
    target = min(_MAX_BLOCK_SUBLANES, max(_CHUNK_SUBLANES, half_rows))
    block_sublanes = max(_CHUNK_SUBLANES,
                         (target // _CHUNK_SUBLANES) * _CHUNK_SUBLANES)
    b_rows = -(-b_rows_needed // block_sublanes) * block_sublanes
    b_pad = b_rows * _LANES
    grid = b_rows // block_sublanes

    # --- input layout: (B,3,3) -> (9, b_rows, 128), minimum HBM passes --------
    # Pad in batch-major layout (identity tail keeps padded lanes well
    # conditioned), then one transpose; reshape afterwards is free.
    x_b9 = module_input.reshape(B, 9)
    pad_n = b_pad - B
    eye_tail = jnp.broadcast_to(jnp.eye(3, dtype=dtype).reshape(1, 9), (pad_n, 9))
    x_pad = jnp.concatenate([x_b9, eye_tail], axis=0)      # (b_pad, 9)
    x_blk = x_pad.T.reshape(9, b_rows, _LANES)

    out = pl.pallas_call(
        _svd_rotation_kernel,
        out_shape=jax.ShapeDtypeStruct((9, b_rows, _LANES), dtype),
        grid_spec=pltpu.PrefetchScalarGridSpec(
            num_scalar_prefetch=0,
            grid=(grid,),
            in_specs=[pl.BlockSpec((9, block_sublanes, _LANES),
                                   lambda i: (0, i, 0))],
            out_specs=pl.BlockSpec((9, block_sublanes, _LANES),
                                   lambda i: (0, i, 0)),
        ),
        compiler_params=pltpu.CompilerParams(dimension_semantics=("parallel",)),
    )(x_blk)

    # Output: slice + transpose fuse into a single pass; reshapes are free.
    return out.reshape(9, b_pad)[:, :B].T.reshape(B, 3, 3)


# Straight-through gradient of  R - A.detach() + A  is the identity; express it
# outside the kernel (pallas_call is not auto-differentiable and stop_gradient
# cannot live inside the kernel).  Forward value is identical (== R).
@jax.custom_vjp
def svd_rotation_projection(module_input):
    return _svd_rotation_forward(module_input)


def _svd_fwd(module_input):
    return _svd_rotation_forward(module_input), None


def _svd_bwd(_, g):
    return (g,)


svd_rotation_projection.defvjp(_svd_fwd, _svd_bwd)


if __name__ == "__main__":
    key = jax.random.PRNGKey(0)
    B = 8
    x = jax.random.normal(key, (B, 3, 3), dtype=jnp.float32)

    out = jax.block_until_ready(svd_rotation_projection(x))

    # Reference: U @ V^T from SVD (same as torch.svd's U @ V.t()).
    U, _, Vh = jnp.linalg.svd(x)
    ref = jnp.einsum("bij,bjk->bik", U, Vh)

    max_err = float(jnp.max(jnp.abs(out - ref)))
    assert max_err < 1e-3, f"projection mismatch, max abs err = {max_err}"

    # sanity: outputs are orthogonal
    eye_err = float(jnp.max(jnp.abs(
        jnp.einsum("bij,bkj->bik", out, out) - jnp.eye(3)[None])))
    assert eye_err < 1e-3, f"output not orthogonal, err = {eye_err}"

    print("KERNEL_OK")
</pallas_src>

<mosaic_0001>
module attributes {stable_mosaic.version = 11 : i64} {
  func.func @_svd_rotation_kernel(%arg0: i32, %arg1: memref<9x8x128xf32, #tpu.memory_space<vmem>>, %arg2: memref<9x8x128xf32, #tpu.memory_space<vmem>>) attributes {dimension_semantics = [#tpu.dimension_semantics<parallel>], iteration_bounds = array<i64: 1>, scalar_prefetch = 0 : i64, scratch_operands = 0 : i64, tpu.core_type = #tpu.core_type<tc>, window_params = [{transform_indices = @transform_0, window_bounds = array<i64: 9, 8, 128>}, {transform_indices = @transform_1, window_bounds = array<i64: 9, 8, 128>}]} {
    %c0_i32 = arith.constant 0 : i32
    %c8_i32 = arith.constant 8 : i32
    %0 = arith.muli %c0_i32, %c8_i32 : i32
    %1 = tpu.assume_multiple %0, 8 : i32
    %c0 = arith.constant 0 : index
    %2 = arith.index_cast %1 : i32 to index
    %c0_0 = arith.constant 0 : index
    %3 = vector.load %arg1[%c0, %2, %c0_0] : memref<9x8x128xf32, #tpu.memory_space<vmem>>, vector<1x8x128xf32>
    %4 = vector.shape_cast %3 : vector<1x8x128xf32> to vector<8x128xf32>
    %c1 = arith.constant 1 : index
    %5 = arith.index_cast %1 : i32 to index
    %c0_1 = arith.constant 0 : index
    %6 = vector.load %arg1[%c1, %5, %c0_1] : memref<9x8x128xf32, #tpu.memory_space<vmem>>, vector<1x8x128xf32>
    %7 = vector.shape_cast %6 : vector<1x8x128xf32> to vector<8x128xf32>
    %c2 = arith.constant 2 : index
    %8 = arith.index_cast %1 : i32 to index
    %c0_2 = arith.constant 0 : index
    %9 = vector.load %arg1[%c2, %8, %c0_2] : memref<9x8x128xf32, #tpu.memory_space<vmem>>, vector<1x8x128xf32>
    %10 = vector.shape_cast %9 : vector<1x8x128xf32> to vector<8x128xf32>
    %c3 = arith.constant 3 : index
    %11 = arith.index_cast %1 : i32 to index
    %c0_3 = arith.constant 0 : index
    %12 = vector.load %arg1[%c3, %11, %c0_3] : memref<9x8x128xf32, #tpu.memory_space<vmem>>, vector<1x8x128xf32>
    %13 = vector.shape_cast %12 : vector<1x8x128xf32> to vector<8x128xf32>
    %c4 = arith.constant 4 : index
    %14 = arith.index_cast %1 : i32 to index
    %c0_4 = arith.constant 0 : index
    %15 = vector.load %arg1[%c4, %14, %c0_4] : memref<9x8x128xf32, #tpu.memory_space<vmem>>, vector<1x8x128xf32>
    %16 = vector.shape_cast %15 : vector<1x8x128xf32> to vector<8x128xf32>
    %c5 = arith.constant 5 : index
    %17 = arith.index_cast %1 : i32 to index
    %c0_5 = arith.constant 0 : index
    %18 = vector.load %arg1[%c5, %17, %c0_5] : memref<9x8x128xf32, #tpu.memory_space<vmem>>, vector<1x8x128xf32>
    %19 = vector.shape_cast %18 : vector<1x8x128xf32> to vector<8x128xf32>
    %c6 = arith.constant 6 : index
    %20 = arith.index_cast %1 : i32 to index
    %c0_6 = arith.constant 0 : index
    %21 = vector.load %arg1[%c6, %20, %c0_6] : memref<9x8x128xf32, #tpu.memory_space<vmem>>, vector<1x8x128xf32>
    %22 = vector.shape_cast %21 : vector<1x8x128xf32> to vector<8x128xf32>
    %c7 = arith.constant 7 : index
    %23 = arith.index_cast %1 : i32 to index
    %c0_7 = arith.constant 0 : index
    %24 = vector.load %arg1[%c7, %23, %c0_7] : memref<9x8x128xf32, #tpu.memory_space<vmem>>, vector<1x8x128xf32>
    %25 = vector.shape_cast %24 : vector<1x8x128xf32> to vector<8x128xf32>
    %c8 = arith.constant 8 : index
    %26 = arith.index_cast %1 : i32 to index
    %c0_8 = arith.constant 0 : index
    %27 = vector.load %arg1[%c8, %26, %c0_8] : memref<9x8x128xf32, #tpu.memory_space<vmem>>, vector<1x8x128xf32>
    %28 = vector.shape_cast %27 : vector<1x8x128xf32> to vector<8x128xf32>
    %29 = arith.mulf %16, %28 : vector<8x128xf32>
    %30 = arith.mulf %19, %25 : vector<8x128xf32>
    %31 = arith.subf %29, %30 : vector<8x128xf32>
    %32 = arith.mulf %19, %22 : vector<8x128xf32>
    %33 = arith.mulf %13, %28 : vector<8x128xf32>
    %34 = arith.subf %32, %33 : vector<8x128xf32>
    %35 = arith.mulf %13, %25 : vector<8x128xf32>
    %36 = arith.mulf %16, %22 : vector<8x128xf32>
    %37 = arith.subf %35, %36 : vector<8x128xf32>
    %38 = arith.mulf %10, %25 : vector<8x128xf32>
    %39 = arith.mulf %7, %28 : vector<8x128xf32>
    %40 = arith.subf %38, %39 : vector<8x128xf32>
    %41 = arith.mulf %4, %28 : vector<8x128xf32>
    %42 = arith.mulf %10, %22 : vector<8x128xf32>
    %43 = arith.subf %41, %42 : vector<8x128xf32>
    %44 = arith.mulf %7, %22 : vector<8x128xf32>
    %45 = arith.mulf %4, %25 : vector<8x128xf32>
    %46 = arith.subf %44, %45 : vector<8x128xf32>
    %47 = arith.mulf %7, %19 : vector<8x128xf32>
    %48 = arith.mulf %10, %16 : vector<8x128xf32>
    %49 = arith.subf %47, %48 : vector<8x128xf32>
    %50 = arith.mulf %10, %13 : vector<8x128xf32>
    %51 = arith.mulf %4, %19 : vector<8x128xf32>
    %52 = arith.subf %50, %51 : vector<8x128xf32>
    %53 = arith.mulf %4, %16 : vector<8x128xf32>
    %54 = arith.mulf %7, %13 : vector<8x128xf32>
    %55 = arith.subf %53, %54 : vector<8x128xf32>
    %56 = arith.mulf %4, %31 : vector<8x128xf32>
    %57 = arith.mulf %7, %34 : vector<8x128xf32>
    %58 = arith.addf %56, %57 : vector<8x128xf32>
    %59 = arith.mulf %10, %37 : vector<8x128xf32>
    %60 = arith.addf %58, %59 : vector<8x128xf32>
    %61 = math.absf %60 : vector<8x128xf32>
    %cst = arith.constant 1.000000e-30 : f32
    %62 = vector.broadcast %cst : f32 to vector<8x128xf32>
    %63 = arith.maximumf %61, %62 : vector<8x128xf32>
    %64 = math.log %63 : vector<8x128xf32>
    %cst_9 = arith.constant -0.333333343 : f32
    %65 = vector.broadcast %cst_9 : f32 to vector<8x128xf32>
    %66 = arith.mulf %64, %65 : vector<8x128xf32>
    %67 = math.exp %66 : vector<8x128xf32>
    %68 = arith.mulf %67, %67 : vector<8x128xf32>
    %cst_10 = arith.constant 0.000000e+00 : f32
    %69 = vector.broadcast %cst_10 : f32 to vector<8x128xf32>
    %70 = arith.cmpf olt, %60, %69 : vector<8x128xf32>
    %cst_11 = arith.constant 0.000000e+00 : f32
    %71 = vector.broadcast %cst_11 : f32 to vector<8x128xf32>
    %72 = arith.subf %71, %68 : vector<8x128xf32>
    %73 = arith.select %70, %72, %68 : vector<8x128xi1>, vector<8x128xf32>
    %cst_12 = arith.constant 5.000000e-01 : f32
    %74 = vector.broadcast %cst_12 : f32 to vector<8x128xf32>
    %75 = arith.mulf %74, %67 : vector<8x128xf32>
    %cst_13 = arith.constant 5.000000e-01 : f32
    %76 = vector.broadcast %cst_13 : f32 to vector<8x128xf32>
    %77 = arith.mulf %76, %73 : vector<8x128xf32>
    %78 = arith.mulf %75, %4 : vector<8x128xf32>
    %79 = arith.mulf %77, %31 : vector<8x128xf32>
    %80 = arith.addf %78, %79 : vector<8x128xf32>
    %81 = arith.mulf %75, %7 : vector<8x128xf32>
    %82 = arith.mulf %77, %34 : vector<8x128xf32>
    %83 = arith.addf %81, %82 : vector<8x128xf32>
    %84 = arith.mulf %75, %10 : vector<8x128xf32>
    %85 = arith.mulf %77, %37 : vector<8x128xf32>
    %86 = arith.addf %84, %85 : vector<8x128xf32>
    %87 = arith.mulf %75, %13 : vector<8x128xf32>
    %88 = arith.mulf %77, %40 : vector<8x128xf32>
    %89 = arith.addf %87, %88 : vector<8x128xf32>
    %90 = arith.mulf %75, %16 : vector<8x128xf32>
    %91 = arith.mulf %77, %43 : vector<8x128xf32>
    %92 = arith.addf %90, %91 : vector<8x128xf32>
    %93 = arith.mulf %75, %19 : vector<8x128xf32>
    %94 = arith.mulf %77, %46 : vector<8x128xf32>
    %95 = arith.addf %93, %94 : vector<8x128xf32>
    %96 = arith.mulf %75, %22 : vector<8x128xf32>
    %97 = arith.mulf %77, %49 : vector<8x128xf32>
    %98 = arith.addf %96, %97 : vector<8x128xf32>
    %99 = arith.mulf %75, %25 : vector<8x128xf32>
    %100 = arith.mulf %77, %52 : vector<8x128xf32>
    %101 = arith.addf %99, %100 : vector<8x128xf32>
    %102 = arith.mulf %75, %28 : vector<8x128xf32>
    %103 = arith.mulf %77, %55 : vector<8x128xf32>
    %104 = arith.addf %102, %103 : vector<8x128xf32>
    %105 = arith.mulf %92, %104 : vector<8x128xf32>
    %106 = arith.mulf %95, %101 : vector<8x128xf32>
    %107 = arith.subf %105, %106 : vector<8x128xf32>
    %108 = arith.mulf %95, %98 : vector<8x128xf32>
    %109 = arith.mulf %89, %104 : vector<8x128xf32>
    %110 = arith.subf %108, %109 : vector<8x128xf32>
    %111 = arith.mulf %89, %101 : vector<8x128xf32>
    %112 = arith.mulf %92, %98 : vector<8x128xf32>
    %113 = arith.subf %111, %112 : vector<8x128xf32>
    %114 = arith.mulf %86, %101 : vector<8x128xf32>
    %115 = arith.mulf %83, %104 : vector<8x128xf32>
    %116 = arith.subf %114, %115 : vector<8x128xf32>
    %117 = arith.mulf %80, %104 : vector<8x128xf32>
    %118 = arith.mulf %86, %98 : vector<8x128xf32>
    %119 = arith.subf %117, %118 : vector<8x128xf32>
    %120 = arith.mulf %83, %98 : vector<8x128xf32>
    %121 = arith.mulf %80, %101 : vector<8x128xf32>
    %122 = arith.subf %120, %121 : vector<8x128xf32>
    %123 = arith.mulf %83, %95 : vector<8x128xf32>
    %124 = arith.mulf %86, %92 : vector<8x128xf32>
    %125 = arith.subf %123, %124 : vector<8x128xf32>
    %126 = arith.mulf %86, %89 : vector<8x128xf32>
    %127 = arith.mulf %80, %95 : vector<8x128xf32>
    %128 = arith.subf %126, %127 : vector<8x128xf32>
    %129 = arith.mulf %80, %92 : vector<8x128xf32>
    %130 = arith.mulf %83, %89 : vector<8x128xf32>
    %131 = arith.subf %129, %130 : vector<8x128xf32>
    %132 = arith.mulf %80, %107 : vector<8x128xf32>
    %133 = arith.mulf %83, %110 : vector<8x128xf32>
    %134 = arith.addf %132, %133 : vector<8x128xf32>
    %135 = arith.mulf %86, %113 : vector<8x128xf32>
    %136 = arith.addf %134, %135 : vector<8x128xf32>
    %137 = math.absf %136 : vector<8x128xf32>
    %cst_14 = arith.constant 1.000000e-30 : f32
    %138 = vector.broadcast %cst_14 : f32 to vector<8x128xf32>
    %139 = arith.maximumf %137, %138 : vector<8x128xf32>
    %140 = math.log %139 : vector<8x128xf32>
    %cst_15 = arith.constant -0.333333343 : f32
    %141 = vector.broadcast %cst_15 : f32 to vector<8x128xf32>
    %142 = arith.mulf %140, %141 : vector<8x128xf32>
    %143 = math.exp %142 : vector<8x128xf32>
    %144 = arith.mulf %143, %143 : vector<8x128xf32>
    %cst_16 = arith.constant 0.000000e+00 : f32
    %145 = vector.broadcast %cst_16 : f32 to vector<8x128xf32>
    %146 = arith.cmpf olt, %136, %145 : vector<8x128xf32>
    %cst_17 = arith.constant 0.000000e+00 : f32
    %147 = vector.broadcast %cst_17 : f32 to vector<8x128xf32>
    %148 = arith.subf %147, %144 : vector<8x128xf32>
    %149 = arith.select %146, %148, %144 : vector<8x128xi1>, vector<8x128xf32>
    %cst_18 = arith.constant 5.000000e-01 : f32
    %150 = vector.broadcast %cst_18 : f32 to vector<8x128xf32>
    %151 = arith.mulf %150, %143 : vector<8x128xf32>
    %cst_19 = arith.constant 5.000000e-01 : f32
    %152 = vector.broadcast %cst_19 : f32 to vector<8x128xf32>
    %153 = arith.mulf %152, %149 : vector<8x128xf32>
    %154 = arith.mulf %151, %80 : vector<8x128xf32>
    %155 = arith.mulf %153, %107 : vector<8x128xf32>
    %156 = arith.addf %154, %155 : vector<8x128xf32>
    %157 = arith.mulf %151, %83 : vector<8x128xf32>
    %158 = arith.mulf %153, %110 : vector<8x128xf32>
    %159 = arith.addf %157, %158 : vector<8x128xf32>
    %160 = arith.mulf %151, %86 : vector<8x128xf32>
    %161 = arith.mulf %153, %113 : vector<8x128xf32>
    %162 = arith.addf %160, %161 : vector<8x128xf32>
    %163 = arith.mulf %151, %89 : vector<8x128xf32>
    %164 = arith.mulf %153, %116 : vector<8x128xf32>
    %165 = arith.addf %163, %164 : vector<8x128xf32>
    %166 = arith.mulf %151, %92 : vector<8x128xf32>
    %167 = arith.mulf %153, %119 : vector<8x128xf32>
    %168 = arith.addf %166, %167 : vector<8x128xf32>
    %169 = arith.mulf %151, %95 : vector<8x128xf32>
    %170 = arith.mulf %153, %122 : vector<8x128xf32>
    %171 = arith.addf %169, %170 : vector<8x128xf32>
    %172 = arith.mulf %151, %98 : vector<8x128xf32>
    %173 = arith.mulf %153, %125 : vector<8x128xf32>
    %174 = arith.addf %172, %173 : vector<8x128xf32>
    %175 = arith.mulf %151, %101 : vector<8x128xf32>
    %176 = arith.mulf %153, %128 : vector<8x128xf32>
    %177 = arith.addf %175, %176 : vector<8x128xf32>
    %178 = arith.mulf %151, %104 : vector<8x128xf32>
    %179 = arith.mulf %153, %131 : vector<8x128xf32>
    %180 = arith.addf %178, %179 : vector<8x128xf32>
    %181 = arith.mulf %168, %180 : vector<8x128xf32>
    %182 = arith.mulf %171, %177 : vector<8x128xf32>
    %183 = arith.subf %181, %182 : vector<8x128xf32>
    %184 = arith.mulf %171, %174 : vector<8x128xf32>
    %185 = arith.mulf %165, %180 : vector<8x128xf32>
    %186 = arith.subf %184, %185 : vector<8x128xf32>
    %187 = arith.mulf %165, %177 : vector<8x128xf32>
    %188 = arith.mulf %168, %174 : vector<8x128xf32>
    %189 = arith.subf %187, %188 : vector<8x128xf32>
    %190 = arith.mulf %162, %177 : vector<8x128xf32>
    %191 = arith.mulf %159, %180 : vector<8x128xf32>
    %192 = arith.subf %190, %191 : vector<8x128xf32>
    %193 = arith.mulf %156, %180 : vector<8x128xf32>
    %194 = arith.mulf %162, %174 : vector<8x128xf32>
    %195 = arith.subf %193, %194 : vector<8x128xf32>
    %196 = arith.mulf %159, %174 : vector<8x128xf32>
    %197 = arith.mulf %156, %177 : vector<8x128xf32>
    %198 = arith.subf %196, %197 : vector<8x128xf32>
    %199 = arith.mulf %159, %171 : vector<8x128xf32>
    %200 = arith.mulf %162, %168 : vector<8x128xf32>
    %201 = arith.subf %199, %200 : vector<8x128xf32>
    %202 = arith.mulf %162, %165 : vector<8x128xf32>
    %203 = arith.mulf %156, %171 : vector<8x128xf32>
    %204 = arith.subf %202, %203 : vector<8x128xf32>
    %205 = arith.mulf %156, %168 : vector<8x128xf32>
    %206 = arith.mulf %159, %165 : vector<8x128xf32>
    %207 = arith.subf %205, %206 : vector<8x128xf32>
    %208 = arith.mulf %156, %183 : vector<8x128xf32>
    %209 = arith.mulf %159, %186 : vector<8x128xf32>
    %210 = arith.addf %208, %209 : vector<8x128xf32>
    %211 = arith.mulf %162, %189 : vector<8x128xf32>
    %212 = arith.addf %210, %211 : vector<8x128xf32>
    %213 = math.absf %212 : vector<8x128xf32>
    %cst_20 = arith.constant 1.000000e-30 : f32
    %214 = vector.broadcast %cst_20 : f32 to vector<8x128xf32>
    %215 = arith.maximumf %213, %214 : vector<8x128xf32>
    %216 = math.log %215 : vector<8x128xf32>
    %cst_21 = arith.constant -0.333333343 : f32
    %217 = vector.broadcast %cst_21 : f32 to vector<8x128xf32>
    %218 = arith.mulf %216, %217 : vector<8x128xf32>
    %219 = math.exp %218 : vector<8x128xf32>
    %220 = arith.mulf %219, %219 : vector<8x128xf32>
    %cst_22 = arith.constant 0.000000e+00 : f32
    %221 = vector.broadcast %cst_22 : f32 to vector<8x128xf32>
    %222 = arith.cmpf olt, %212, %221 : vector<8x128xf32>
    %cst_23 = arith.constant 0.000000e+00 : f32
    %223 = vector.broadcast %cst_23 : f32 to vector<8x128xf32>
    %224 = arith.subf %223, %220 : vector<8x128xf32>
    %225 = arith.select %222, %224, %220 : vector<8x128xi1>, vector<8x128xf32>
    %cst_24 = arith.constant 5.000000e-01 : f32
    %226 = vector.broadcast %cst_24 : f32 to vector<8x128xf32>
    %227 = arith.mulf %226, %219 : vector<8x128xf32>
    %cst_25 = arith.constant 5.000000e-01 : f32
    %228 = vector.broadcast %cst_25 : f32 to vector<8x128xf32>
    %229 = arith.mulf %228, %225 : vector<8x128xf32>
    %230 = arith.mulf %227, %156 : vector<8x128xf32>
    %231 = arith.mulf %229, %183 : vector<8x128xf32>
    %232 = arith.addf %230, %231 : vector<8x128xf32>
    %233 = arith.mulf %227, %159 : vector<8x128xf32>
    %234 = arith.mulf %229, %186 : vector<8x128xf32>
    %235 = arith.addf %233, %234 : vector<8x128xf32>
    %236 = arith.mulf %227, %162 : vector<8x128xf32>
    %237 = arith.mulf %229, %189 : vector<8x128xf32>
    %238 = arith.addf %236, %237 : vector<8x128xf32>
    %239 = arith.mulf %227, %165 : vector<8x128xf32>
    %240 = arith.mulf %229, %192 : vector<8x128xf32>
    %241 = arith.addf %239, %240 : vector<8x128xf32>
    %242 = arith.mulf %227, %168 : vector<8x128xf32>
    %243 = arith.mulf %229, %195 : vector<8x128xf32>
    %244 = arith.addf %242, %243 : vector<8x128xf32>
    %245 = arith.mulf %227, %171 : vector<8x128xf32>
    %246 = arith.mulf %229, %198 : vector<8x128xf32>
    %247 = arith.addf %245, %246 : vector<8x128xf32>
    %248 = arith.mulf %227, %174 : vector<8x128xf32>
    %249 = arith.mulf %229, %201 : vector<8x128xf32>
    %250 = arith.addf %248, %249 : vector<8x128xf32>
    %251 = arith.mulf %227, %177 : vector<8x128xf32>
    %252 = arith.mulf %229, %204 : vector<8x128xf32>
    %253 = arith.addf %251, %252 : vector<8x128xf32>
    %254 = arith.mulf %227, %180 : vector<8x128xf32>
    %255 = arith.mulf %229, %207 : vector<8x128xf32>
    %256 = arith.addf %254, %255 : vector<8x128xf32>
    %257 = arith.mulf %244, %256 : vector<8x128xf32>
    %258 = arith.mulf %247, %253 : vector<8x128xf32>
    %259 = arith.subf %257, %258 : vector<8x128xf32>
    %260 = arith.mulf %247, %250 : vector<8x128xf32>
    %261 = arith.mulf %241, %256 : vector<8x128xf32>
    %262 = arith.subf %260, %261 : vector<8x128xf32>
    %263 = arith.mulf %241, %253 : vector<8x128xf32>
    %264 = arith.mulf %244, %250 : vector<8x128xf32>
    %265 = arith.subf %263, %264 : vector<8x128xf32>
    %266 = arith.mulf %238, %253 : vector<8x128xf32>
    %267 = arith.mulf %235, %256 : vector<8x128xf32>
    %268 = arith.subf %266, %267 : vector<8x128xf32>
    %269 = arith.mulf %232, %256 : vector<8x128xf32>
    %270 = arith.mulf %238, %250 : vector<8x128xf32>
    %271 = arith.subf %269, %270 : vector<8x128xf32>
    %272 = arith.mulf %235, %250 : vector<8x128xf32>
    %273 = arith.mulf %232, %253 : vector<8x128xf32>
    %274 = arith.subf %272, %273 : vector<8x128xf32>
    %275 = arith.mulf %235, %247 : vector<8x128xf32>
    %276 = arith.mulf %238, %244 : vector<8x128xf32>
    %277 = arith.subf %275, %276 : vector<8x128xf32>
    %278 = arith.mulf %238, %241 : vector<8x128xf32>
    %279 = arith.mulf %232, %247 : vector<8x128xf32>
    %280 = arith.subf %278, %279 : vector<8x128xf32>
    %281 = arith.mulf %232, %244 : vector<8x128xf32>
    %282 = arith.mulf %235, %241 : vector<8x128xf32>
    %283 = arith.subf %281, %282 : vector<8x128xf32>
    %284 = arith.mulf %232, %259 : vector<8x128xf32>
    %285 = arith.mulf %235, %262 : vector<8x128xf32>
    %286 = arith.addf %284, %285 : vector<8x128xf32>
    %287 = arith.mulf %238, %265 : vector<8x128xf32>
    %288 = arith.addf %286, %287 : vector<8x128xf32>
    %289 = tpu.reciprocal %288 {approx = true} : vector<8x128xf32> -> vector<8x128xf32>
    %290 = arith.mulf %288, %289 : vector<8x128xf32>
    %cst_26 = arith.constant 2.000000e+00 : f32
    %291 = vector.broadcast %cst_26 : f32 to vector<8x128xf32>
    %292 = arith.subf %291, %290 : vector<8x128xf32>
    %293 = arith.mulf %289, %292 : vector<8x128xf32>
    %294 = arith.mulf %293, %259 : vector<8x128xf32>
    %295 = arith.addf %232, %294 : vector<8x128xf32>
    %cst_27 = arith.constant 5.000000e-01 : f32
    %296 = vector.broadcast %cst_27 : f32 to vector<8x128xf32>
    %297 = arith.mulf %296, %295 : vector<8x128xf32>
    %298 = arith.mulf %293, %262 : vector<8x128xf32>
    %299 = arith.addf %235, %298 : vector<8x128xf32>
    %cst_28 = arith.constant 5.000000e-01 : f32
    %300 = vector.broadcast %cst_28 : f32 to vector<8x128xf32>
    %301 = arith.mulf %300, %299 : vector<8x128xf32>
    %302 = arith.mulf %293, %265 : vector<8x128xf32>
    %303 = arith.addf %238, %302 : vector<8x128xf32>
    %cst_29 = arith.constant 5.000000e-01 : f32
    %304 = vector.broadcast %cst_29 : f32 to vector<8x128xf32>
    %305 = arith.mulf %304, %303 : vector<8x128xf32>
    %306 = arith.mulf %293, %268 : vector<8x128xf32>
    %307 = arith.addf %241, %306 : vector<8x128xf32>
    %cst_30 = arith.constant 5.000000e-01 : f32
    %308 = vector.broadcast %cst_30 : f32 to vector<8x128xf32>
    %309 = arith.mulf %308, %307 : vector<8x128xf32>
    %310 = arith.mulf %293, %271 : vector<8x128xf32>
    %311 = arith.addf %244, %310 : vector<8x128xf32>
    %cst_31 = arith.constant 5.000000e-01 : f32
    %312 = vector.broadcast %cst_31 : f32 to vector<8x128xf32>
    %313 = arith.mulf %312, %311 : vector<8x128xf32>
    %314 = arith.mulf %293, %274 : vector<8x128xf32>
    %315 = arith.addf %247, %314 : vector<8x128xf32>
    %cst_32 = arith.constant 5.000000e-01 : f32
    %316 = vector.broadcast %cst_32 : f32 to vector<8x128xf32>
    %317 = arith.mulf %316, %315 : vector<8x128xf32>
    %318 = arith.mulf %293, %277 : vector<8x128xf32>
    %319 = arith.addf %250, %318 : vector<8x128xf32>
    %cst_33 = arith.constant 5.000000e-01 : f32
    %320 = vector.broadcast %cst_33 : f32 to vector<8x128xf32>
    %321 = arith.mulf %320, %319 : vector<8x128xf32>
    %322 = arith.mulf %293, %280 : vector<8x128xf32>
    %323 = arith.addf %253, %322 : vector<8x128xf32>
    %cst_34 = arith.constant 5.000000e-01 : f32
    %324 = vector.broadcast %cst_34 : f32 to vector<8x128xf32>
    %325 = arith.mulf %324, %323 : vector<8x128xf32>
    %326 = arith.mulf %293, %283 : vector<8x128xf32>
    %327 = arith.addf %256, %326 : vector<8x128xf32>
    %cst_35 = arith.constant 5.000000e-01 : f32
    %328 = vector.broadcast %cst_35 : f32 to vector<8x128xf32>
    %329 = arith.mulf %328, %327 : vector<8x128xf32>
    %330 = arith.mulf %313, %329 : vector<8x128xf32>
    %331 = arith.mulf %317, %325 : vector<8x128xf32>
    %332 = arith.subf %330, %331 : vector<8x128xf32>
    %333 = arith.mulf %317, %321 : vector<8x128xf32>
    %334 = arith.mulf %309, %329 : vector<8x128xf32>
    %335 = arith.subf %333, %334 : vector<8x128xf32>
    %336 = arith.mulf %309, %325 : vector<8x128xf32>
    %337 = arith.mulf %313, %321 : vector<8x128xf32>
    %338 = arith.subf %336, %337 : vector<8x128xf32>
    %339 = arith.mulf %305, %325 : vector<8x128xf32>
    %340 = arith.mulf %301, %329 : vector<8x128xf32>
    %341 = arith.subf %339, %340 : vector<8x128xf32>
    %342 = arith.mulf %297, %329 : vector<8x128xf32>
    %343 = arith.mulf %305, %321 : vector<8x128xf32>
    %344 = arith.subf %342, %343 : vector<8x128xf32>
    %345 = arith.mulf %301, %321 : vector<8x128xf32>
    %346 = arith.mulf %297, %325 : vector<8x128xf32>
    %347 = arith.subf %345, %346 : vector<8x128xf32>
    %348 = arith.mulf %301, %317 : vector<8x128xf32>
    %349 = arith.mulf %305, %313 : vector<8x128xf32>
    %350 = arith.subf %348, %349 : vector<8x128xf32>
    %351 = arith.mulf %305, %309 : vector<8x128xf32>
    %352 = arith.mulf %297, %317 : vector<8x128xf32>
    %353 = arith.subf %351, %352 : vector<8x128xf32>
    %354 = arith.mulf %297, %313 : vector<8x128xf32>
    %355 = arith.mulf %301, %309 : vector<8x128xf32>
    %356 = arith.subf %354, %355 : vector<8x128xf32>
    %357 = arith.mulf %297, %332 : vector<8x128xf32>
    %358 = arith.mulf %301, %335 : vector<8x128xf32>
    %359 = arith.addf %357, %358 : vector<8x128xf32>
    %360 = arith.mulf %305, %338 : vector<8x128xf32>
    %361 = arith.addf %359, %360 : vector<8x128xf32>
    %362 = tpu.reciprocal %361 {approx = true} : vector<8x128xf32> -> vector<8x128xf32>
    %363 = arith.mulf %361, %362 : vector<8x128xf32>
    %cst_36 = arith.constant 2.000000e+00 : f32
    %364 = vector.broadcast %cst_36 : f32 to vector<8x128xf32>
    %365 = arith.subf %364, %363 : vector<8x128xf32>
    %366 = arith.mulf %362, %365 : vector<8x128xf32>
    %367 = arith.mulf %366, %332 : vector<8x128xf32>
    %368 = arith.addf %297, %367 : vector<8x128xf32>
    %cst_37 = arith.constant 5.000000e-01 : f32
    %369 = vector.broadcast %cst_37 : f32 to vector<8x128xf32>
    %370 = arith.mulf %369, %368 : vector<8x128xf32>
    %371 = arith.mulf %366, %335 : vector<8x128xf32>
    %372 = arith.addf %301, %371 : vector<8x128xf32>
    %cst_38 = arith.constant 5.000000e-01 : f32
    %373 = vector.broadcast %cst_38 : f32 to vector<8x128xf32>
    %374 = arith.mulf %373, %372 : vector<8x128xf32>
    %375 = arith.mulf %366, %338 : vector<8x128xf32>
    %376 = arith.addf %305, %375 : vector<8x128xf32>
    %cst_39 = arith.constant 5.000000e-01 : f32
    %377 = vector.broadcast %cst_39 : f32 to vector<8x128xf32>
    %378 = arith.mulf %377, %376 : vector<8x128xf32>
    %379 = arith.mulf %366, %341 : vector<8x128xf32>
    %380 = arith.addf %309, %379 : vector<8x128xf32>
    %cst_40 = arith.constant 5.000000e-01 : f32
    %381 = vector.broadcast %cst_40 : f32 to vector<8x128xf32>
    %382 = arith.mulf %381, %380 : vector<8x128xf32>
    %383 = arith.mulf %366, %344 : vector<8x128xf32>
    %384 = arith.addf %313, %383 : vector<8x128xf32>
    %cst_41 = arith.constant 5.000000e-01 : f32
    %385 = vector.broadcast %cst_41 : f32 to vector<8x128xf32>
    %386 = arith.mulf %385, %384 : vector<8x128xf32>
    %387 = arith.mulf %366, %347 : vector<8x128xf32>
    %388 = arith.addf %317, %387 : vector<8x128xf32>
    %cst_42 = arith.constant 5.000000e-01 : f32
    %389 = vector.broadcast %cst_42 : f32 to vector<8x128xf32>
    %390 = arith.mulf %389, %388 : vector<8x128xf32>
    %391 = arith.mulf %366, %350 : vector<8x128xf32>
    %392 = arith.addf %321, %391 : vector<8x128xf32>
    %cst_43 = arith.constant 5.000000e-01 : f32
    %393 = vector.broadcast %cst_43 : f32 to vector<8x128xf32>
    %394 = arith.mulf %393, %392 : vector<8x128xf32>
    %395 = arith.mulf %366, %353 : vector<8x128xf32>
    %396 = arith.addf %325, %395 : vector<8x128xf32>
    %cst_44 = arith.constant 5.000000e-01 : f32
    %397 = vector.broadcast %cst_44 : f32 to vector<8x128xf32>
    %398 = arith.mulf %397, %396 : vector<8x128xf32>
    %399 = arith.mulf %366, %356 : vector<8x128xf32>
    %400 = arith.addf %329, %399 : vector<8x128xf32>
    %cst_45 = arith.constant 5.000000e-01 : f32
    %401 = vector.broadcast %cst_45 : f32 to vector<8x128xf32>
    %402 = arith.mulf %401, %400 : vector<8x128xf32>
    %403 = arith.mulf %386, %402 : vector<8x128xf32>
    %404 = arith.mulf %390, %398 : vector<8x128xf32>
    %405 = arith.subf %403, %404 : vector<8x128xf32>
    %406 = arith.mulf %390, %394 : vector<8x128xf32>
    %407 = arith.mulf %382, %402 : vector<8x128xf32>
    %408 = arith.subf %406, %407 : vector<8x128xf32>
    %409 = arith.mulf %382, %398 : vector<8x128xf32>
    %410 = arith.mulf %386, %394 : vector<8x128xf32>
    %411 = arith.subf %409, %410 : vector<8x128xf32>
    %412 = arith.mulf %378, %398 : vector<8x128xf32>
    %413 = arith.mulf %374, %402 : vector<8x128xf32>
    %414 = arith.subf %412, %413 : vector<8x128xf32>
    %415 = arith.mulf %370, %402 : vector<8x128xf32>
    %416 = arith.mulf %378, %394 : vector<8x128xf32>
    %417 = arith.subf %415, %416 : vector<8x128xf32>
    %418 = arith.mulf %374, %394 : vector<8x128xf32>
    %419 = arith.mulf %370, %398 : vector<8x128xf32>
    %420 = arith.subf %418, %419 : vector<8x128xf32>
    %421 = arith.mulf %374, %390 : vector<8x128xf32>
    %422 = arith.mulf %378, %386 : vector<8x128xf32>
    %423 = arith.subf %421, %422 : vector<8x128xf32>
    %424 = arith.mulf %378, %382 : vector<8x128xf32>
    %425 = arith.mulf %370, %390 : vector<8x128xf32>
    %426 = arith.subf %424, %425 : vector<8x128xf32>
    %427 = arith.mulf %370, %386 : vector<8x128xf32>
    %428 = arith.mulf %374, %382 : vector<8x128xf32>
    %429 = arith.subf %427, %428 : vector<8x128xf32>
    %430 = arith.mulf %370, %405 : vector<8x128xf32>
    %431 = arith.mulf %374, %408 : vector<8x128xf32>
    %432 = arith.addf %430, %431 : vector<8x128xf32>
    %433 = arith.mulf %378, %411 : vector<8x128xf32>
    %434 = arith.addf %432, %433 : vector<8x128xf32>
    %435 = tpu.reciprocal %434 {approx = true} : vector<8x128xf32> -> vector<8x128xf32>
    %436 = arith.mulf %434, %435 : vector<8x128xf32>
    %cst_46 = arith.constant 2.000000e+00 : f32
    %437 = vector.broadcast %cst_46 : f32 to vector<8x128xf32>
    %438 = arith.subf %437, %436 : vector<8x128xf32>
    %439 = arith.mulf %435, %438 : vector<8x128xf32>
    %440 = arith.mulf %439, %405 : vector<8x128xf32>
    %441 = arith.addf %370, %440 : vector<8x128xf32>
    %cst_47 = arith.constant 5.000000e-01 : f32
    %442 = vector.broadcast %cst_47 : f32 to vector<8x128xf32>
    %443 = arith.mulf %442, %441 : vector<8x128xf32>
    %444 = arith.mulf %439, %408 : vector<8x128xf32>
    %445 = arith.addf %374, %444 : vector<8x128xf32>
    %cst_48 = arith.constant 5.000000e-01 : f32
    %446 = vector.broadcast %cst_48 : f32 to vector<8x128xf32>
    %447 = arith.mulf %446, %445 : vector<8x128xf32>
    %448 = arith.mulf %439, %411 : vector<8x128xf32>
    %449 = arith.addf %378, %448 : vector<8x128xf32>
    %cst_49 = arith.constant 5.000000e-01 : f32
    %450 = vector.broadcast %cst_49 : f32 to vector<8x128xf32>
    %451 = arith.mulf %450, %449 : vector<8x128xf32>
    %452 = arith.mulf %439, %414 : vector<8x128xf32>
    %453 = arith.addf %382, %452 : vector<8x128xf32>
    %cst_50 = arith.constant 5.000000e-01 : f32
    %454 = vector.broadcast %cst_50 : f32 to vector<8x128xf32>
    %455 = arith.mulf %454, %453 : vector<8x128xf32>
    %456 = arith.mulf %439, %417 : vector<8x128xf32>
    %457 = arith.addf %386, %456 : vector<8x128xf32>
    %cst_51 = arith.constant 5.000000e-01 : f32
    %458 = vector.broadcast %cst_51 : f32 to vector<8x128xf32>
    %459 = arith.mulf %458, %457 : vector<8x128xf32>
    %460 = arith.mulf %439, %420 : vector<8x128xf32>
    %461 = arith.addf %390, %460 : vector<8x128xf32>
    %cst_52 = arith.constant 5.000000e-01 : f32
    %462 = vector.broadcast %cst_52 : f32 to vector<8x128xf32>
    %463 = arith.mulf %462, %461 : vector<8x128xf32>
    %464 = arith.mulf %439, %423 : vector<8x128xf32>
    %465 = arith.addf %394, %464 : vector<8x128xf32>
    %cst_53 = arith.constant 5.000000e-01 : f32
    %466 = vector.broadcast %cst_53 : f32 to vector<8x128xf32>
    %467 = arith.mulf %466, %465 : vector<8x128xf32>
    %468 = arith.mulf %439, %426 : vector<8x128xf32>
    %469 = arith.addf %398, %468 : vector<8x128xf32>
    %cst_54 = arith.constant 5.000000e-01 : f32
    %470 = vector.broadcast %cst_54 : f32 to vector<8x128xf32>
    %471 = arith.mulf %470, %469 : vector<8x128xf32>
    %472 = arith.mulf %439, %429 : vector<8x128xf32>
    %473 = arith.addf %402, %472 : vector<8x128xf32>
    %cst_55 = arith.constant 5.000000e-01 : f32
    %474 = vector.broadcast %cst_55 : f32 to vector<8x128xf32>
    %475 = arith.mulf %474, %473 : vector<8x128xf32>
    %c0_56 = arith.constant 0 : index
    %476 = arith.index_cast %1 : i32 to index
    %c0_57 = arith.constant 0 : index
    %477 = vector.load %arg2[%c0_56, %476, %c0_57] : memref<9x8x128xf32, #tpu.memory_space<vmem>>, vector<1x8x128xf32>
    %478 = vector.shape_cast %477 : vector<1x8x128xf32> to vector<8x128xf32>
    %479 = vector.shape_cast %443 : vector<8x128xf32> to vector<1x8x128xf32>
    tpu.vector_store %arg2[%c0_56, %476, %c0_57], %479 {strides = array<i32>} : memref<9x8x128xf32, #tpu.memory_space<vmem>>, vector<1x8x128xf32>,
    %c1_58 = arith.constant 1 : index
    %480 = arith.index_cast %1 : i32 to index
    %c0_59 = arith.constant 0 : index
    %481 = vector.load %arg2[%c1_58, %480, %c0_59] : memref<9x8x128xf32, #tpu.memory_space<vmem>>, vector<1x8x128xf32>
    %482 = vector.shape_cast %481 : vector<1x8x128xf32> to vector<8x128xf32>
    %483 = vector.shape_cast %447 : vector<8x128xf32> to vector<1x8x128xf32>
    tpu.vector_store %arg2[%c1_58, %480, %c0_59], %483 {strides = array<i32>} : memref<9x8x128xf32, #tpu.memory_space<vmem>>, vector<1x8x128xf32>,
    %c2_60 = arith.constant 2 : index
    %484 = arith.index_cast %1 : i32 to index
    %c0_61 = arith.constant 0 : index
    %485 = vector.load %arg2[%c2_60, %484, %c0_61] : memref<9x8x128xf32, #tpu.memory_space<vmem>>, vector<1x8x128xf32>
    %486 = vector.shape_cast %485 : vector<1x8x128xf32> to vector<8x128xf32>
    %487 = vector.shape_cast %451 : vector<8x128xf32> to vector<1x8x128xf32>
    tpu.vector_store %arg2[%c2_60, %484, %c0_61], %487 {strides = array<i32>} : memref<9x8x128xf32, #tpu.memory_space<vmem>>, vector<1x8x128xf32>,
    %c3_62 = arith.constant 3 : index
    %488 = arith.index_cast %1 : i32 to index
    %c0_63 = arith.constant 0 : index
    %489 = vector.load %arg2[%c3_62, %488, %c0_63] : memref<9x8x128xf32, #tpu.memory_space<vmem>>, vector<1x8x128xf32>
    %490 = vector.shape_cast %489 : vector<1x8x128xf32> to vector<8x128xf32>
    %491 = vector.shape_cast %455 : vector<8x128xf32> to vector<1x8x128xf32>
    tpu.vector_store %arg2[%c3_62, %488, %c0_63], %491 {strides = array<i32>} : memref<9x8x128xf32, #tpu.memory_space<vmem>>, vector<1x8x128xf32>,
    %c4_64 = arith.constant 4 : index
    %492 = arith.index_cast %1 : i32 to index
    %c0_65 = arith.constant 0 : index
    %493 = vector.load %arg2[%c4_64, %492, %c0_65] : memref<9x8x128xf32, #tpu.memory_space<vmem>>, vector<1x8x128xf32>
    %494 = vector.shape_cast %493 : vector<1x8x128xf32> to vector<8x128xf32>
    %495 = vector.shape_cast %459 : vector<8x128xf32> to vector<1x8x128xf32>
    tpu.vector_store %arg2[%c4_64, %492, %c0_65], %495 {strides = array<i32>} : memref<9x8x128xf32, #tpu.memory_space<vmem>>, vector<1x8x128xf32>,
    %c5_66 = arith.constant 5 : index
    %496 = arith.index_cast %1 : i32 to index
    %c0_67 = arith.constant 0 : index
    %497 = vector.load %arg2[%c5_66, %496, %c0_67] : memref<9x8x128xf32, #tpu.memory_space<vmem>>, vector<1x8x128xf32>
    %498 = vector.shape_cast %497 : vector<1x8x128xf32> to vector<8x128xf32>
    %499 = vector.shape_cast %463 : vector<8x128xf32> to vector<1x8x128xf32>
    tpu.vector_store %arg2[%c5_66, %496, %c0_67], %499 {strides = array<i32>} : memref<9x8x128xf32, #tpu.memory_space<vmem>>, vector<1x8x128xf32>,
    %c6_68 = arith.constant 6 : index
    %500 = arith.index_cast %1 : i32 to index
    %c0_69 = arith.constant 0 : index
    %501 = vector.load %arg2[%c6_68, %500, %c0_69] : memref<9x8x128xf32, #tpu.memory_space<vmem>>, vector<1x8x128xf32>
    %502 = vector.shape_cast %501 : vector<1x8x128xf32> to vector<8x128xf32>
    %503 = vector.shape_cast %467 : vector<8x128xf32> to vector<1x8x128xf32>
    tpu.vector_store %arg2[%c6_68, %500, %c0_69], %503 {strides = array<i32>} : memref<9x8x128xf32, #tpu.memory_space<vmem>>, vector<1x8x128xf32>,
    %c7_70 = arith.constant 7 : index
    %504 = arith.index_cast %1 : i32 to index
    %c0_71 = arith.constant 0 : index
    %505 = vector.load %arg2[%c7_70, %504, %c0_71] : memref<9x8x128xf32, #tpu.memory_space<vmem>>, vector<1x8x128xf32>
    %506 = vector.shape_cast %505 : vector<1x8x128xf32> to vector<8x128xf32>
    %507 = vector.shape_cast %471 : vector<8x128xf32> to vector<1x8x128xf32>
    tpu.vector_store %arg2[%c7_70, %504, %c0_71], %507 {strides = array<i32>} : memref<9x8x128xf32, #tpu.memory_space<vmem>>, vector<1x8x128xf32>,
    %c8_72 = arith.constant 8 : index
    %508 = arith.index_cast %1 : i32 to index
    %c0_73 = arith.constant 0 : index
    %509 = vector.load %arg2[%c8_72, %508, %c0_73] : memref<9x8x128xf32, #tpu.memory_space<vmem>>, vector<1x8x128xf32>
    %510 = vector.shape_cast %509 : vector<1x8x128xf32> to vector<8x128xf32>
    %511 = vector.shape_cast %475 : vector<8x128xf32> to vector<1x8x128xf32>
    tpu.vector_store %arg2[%c8_72, %508, %c0_73], %511 {strides = array<i32>} : memref<9x8x128xf32, #tpu.memory_space<vmem>>, vector<1x8x128xf32>,
    %c1_i32 = arith.constant 1 : i32
    return
  }
  func.func @transform_0(%arg0: i32) -> (i32, i32, i32) {
    %c0_i32 = arith.constant 0 : i32
    %c0_i32_0 = arith.constant 0 : i32
    %c0_i32_1 = arith.constant 0 : i32
    return %c0_i32, %arg0, %c0_i32_0 : i32, i32, i32
  }
  func.func @transform_1(%arg0: i32) -> (i32, i32, i32) {
    %c0_i32 = arith.constant 0 : i32
    %c0_i32_0 = arith.constant 0 : i32
    %c0_i32_1 = arith.constant 0 : i32
    return %c0_i32, %arg0, %c0_i32_0 : i32, i32, i32
  }
}

</mosaic_0001>

<bundles_post_ra>
// kernel: tpu_custom_call.1
= control target key start
LH: loop header
LB: loop body
LE: loop exit
PB: predicated region body
PF: predicated region fallthrough
CT: control target
= control target key end

     0   :  { %6 = vsyncpa [#allocation3], 0  ;;  %s639_s0 = inlined_call_operand.hbm [shape: f32[9,8,128], index: 0, kind: input, shape index: {}]   ;;  %s640_s1 = inlined_call_operand.hbm [shape: f32[9,8,128], index: 1, kind: output, shape index: {}]  }
   0x1   :  { %7 = vsyncpa [#allocation4], 0  ;;  %s569_s6 = smov [#allocation2]  }
   0x2   :  { %s13_s7 = sshll.u32 %s569_s6, 4  ;;  %s14_s7 = int_to_ptr.vmem [resolvable:$true] %s13_s7 }
   0x3   :  { %s533_s8 = scalar_lea.vmem %s14_s7, 1152  ;;  %p538_p1 = scmp.lt.s32.totalorder %s14_s7, %s14_s7 }
   0x4   :  { %p534_p0 = scmp.ne.s32.totalorder %s14_s7, %s533_s8  ;;  %p539_p2 = scmp.lt.s32.totalorder %s533_s8, %s533_s8 }
   0x6   :  { %p540_p3 = por %p539_p2, %p538_p1 }
   0x8   :  { %p541_p4 = pnand %p540_p3, %p534_p0 }
   0xa   :  { %544 = shalt.err (!%p541_p4)
}
   0xb   :  { %s570_s9 = smov 128   ;;  %s571_s10 = smov 8  }
   0xc   :  { %19 = dma.hbm_to_vmem [thread:$0]  %s639_s0, 1152, %s14_s7, [#allocation3], %s570_s9, %s570_s9, %s571_s10  }
   0xd   :  { %565 = dma.done.wait [#allocation3], 1152  }
   0xe   :  { %566 = vsyncadd [#allocation3], 4294966144  ;;  %v32_v0 = vld [vmem:[#allocation2 + $0x18] sm:$0xff]  ;;  %v35_v1 = vld [vmem:[#allocation2 + $0x20] sm:$0xff]  ;;  %s572_s0 = smov [#allocation5]  }
   0xf   :  { %v38_v2 = vld [vmem:[#allocation2 + $0x28] sm:$0xff]  ;;  %v41_v3 = vld [vmem:[#allocation2 + $0x30] sm:$0xff]  ;;  %v44_v4 = vld [vmem:[#allocation2 + $0x38] sm:$0xff]  ;;  %s475_s13 = sshll.u32 %s572_s0, 4  ;;  %s476_s13 = int_to_ptr.vmem [resolvable:$true] %s475_s13 }
  0x10   :  { %v589_v5 = vld [vmem:[#allocation2 + $0x40] sm:$0xff]  ;;  %v49_v7 = vmul.f32 %v44_v4, %v38_v2  ;;  %v51_v8 = vmul.f32 %v41_v3, %v38_v2  ;;  %v54_v10 = vmul.f32 %v44_v4, %v32_v0  ;;  %v55_v11 = vmul.f32 %v41_v3, %v35_v1  ;;  %v26_v13 = vld [vmem:[#allocation2 + $0x8] sm:$0xff]  ;;  %v29_v16 = vld [vmem:[#allocation2 + $0x10] sm:$0xff]  ;;  %s545_s14 = scalar_lea.vmem %s476_s13, 1152  ;;  %p550_p6 = scmp.lt.s32.totalorder %s476_s13, %s476_s13 }
  0x11   :  { %v48_v6 = vmul.f32 %v589_v5, %v35_v1  ;;  %v52_v9 = vmul.f32 %v589_v5, %v32_v0  ;;  %v23_v12 = vld [vmem:[#allocation2] sm:$0xff]  ;;  %v66_v29 = vmul.f32 %v38_v2, %v26_v13  ;;  %v67_v30 = vmul.f32 %v35_v1, %v29_v16  ;;  %p546_p5 = scmp.ne.s32.totalorder %s476_s13, %s545_s14  ;;  %p551_p7 = scmp.lt.s32.totalorder %s545_s14, %s545_s14 }
  0x12   :  { %v56_v17 = vsub.f32 %v54_v10, %v55_v11  ;;  %v69_v31 = vmul.f32 %v32_v0, %v29_v16  ;;  %v57_v33 = vmul.f32 %v44_v4, %v29_v16  ;;  %v58_v34 = vmul.f32 %v589_v5, %v26_v13 }
  0x13   :  { %v50_v14 = vsub.f32 %v48_v6, %v49_v7  ;;  %v53_v15 = vsub.f32 %v51_v8, %v52_v9  ;;  %v60_v35 = vmul.f32 %v589_v5, %v23_v12  ;;  %v61_v36 = vmul.f32 %v41_v3, %v29_v16  ;;  %p552_p8 = por %p551_p7, %p550_p6 }
  0x14   :  { %v78_v20 = vmul.f32 %v56_v17, %v29_v16  ;;  %v63_v37 = vmul.f32 %v41_v3, %v26_v13  ;;  %v64_v38 = vmul.f32 %v44_v4, %v23_v12  ;;  %v70_v39 = vmul.f32 %v38_v2, %v23_v12 }
  0x15   :  { %v75_v18 = vmul.f32 %v50_v14, %v23_v12  ;;  %v76_v19 = vmul.f32 %v53_v15, %v26_v13  ;;  %v59_v43 = vsub.f32 %v57_v33, %v58_v34  ;;  %v62_v44 = vsub.f32 %v60_v35, %v61_v36  ;;  %p553_p9 = pnand %p552_p8, %p546_p5 }
  0x16   :  { %v72_v45 = vmul.f32 %v35_v1, %v23_v12  ;;  %v73_v46 = vmul.f32 %v32_v0, %v26_v13  ;;  %v65_v47 = vsub.f32 %v63_v37, %v64_v38  ;;  %v68_v48 = vsub.f32 %v66_v29, %v67_v30 }
  0x17   :  { %v77_v21 = vadd.f32 %v76_v19, %v75_v18  ;;  %v71_v49 = vsub.f32 %v69_v31, %v70_v39 }
  0x18   :  { %v74_v57 = vsub.f32 %v72_v45, %v73_v46 }
  0x19   :  { %v79_v22 = vadd.f32 %v78_v20, %v77_v21 }
  0x1b   :  { %v80_v23 = vand.u32 2147483647, %v79_v22  ;;  %vm88_vm0 = vcmp.lt.f32.partialorder %v79_v22, 0.0 }
  0x1d   :  { %v81_v24 = vmax.f32 %v80_v23, 1e-30 }
  0x1f   :  { %507 = vlog2.f32 %v81_v24 }
  0x2c   :  { %v508_v25 = vpop.eup %507 }
  0x2d   :  { %v83_v26 = vmul.f32 0.6931472, %v508_v25 }
  0x2f   :  { %v84_v27 = vmul.f32 -0.33333334, %v83_v26 }
  0x31   :  { %v85_v28 = vmul.f32 1.442695, %v84_v27 }
  0x33   :  { %509 = vpow2.f32 %v85_v28 }
  0x40   :  { %v510_v32 = vpop.eup %509 }
  0x41   :  { %v87_v40 = vmul.f32 %v510_v32, %v510_v32  ;;  %v91_v41 = vmul.f32 0.5, %v510_v32 }
  0x43   :  { %v89_v42 = vsub.f32 0.0, %v87_v40  ;;  %v102_v52 = vmul.f32 %v91_v41, %v32_v0  ;;  %v105_v53 = vmul.f32 %v91_v41, %v35_v1  ;;  %v108_v54 = vmul.f32 %v91_v41, %v38_v2 }
  0x44   :  { %v111_v55 = vmul.f32 %v91_v41, %v41_v3  ;;  %v114_v56 = vmul.f32 %v91_v41, %v44_v4  ;;  %v93_v58 = vmul.f32 %v91_v41, %v23_v12  ;;  %v96_v59 = vmul.f32 %v91_v41, %v26_v13 }
  0x45   :  { %v90_v50 = vsel %vm88_vm0, %v89_v42, %v87_v40  ;;  %v117_v10 = vmul.f32 %v91_v41, %v589_v5  ;;  %v99_v2 = vmul.f32 %v91_v41, %v29_v16 }
  0x46   :  { %v92_v51 = vmul.f32 0.5, %v90_v50 }
  0x48   :  { %v103_v60 = vmul.f32 %v92_v51, %v59_v43  ;;  %v106_v61 = vmul.f32 %v92_v51, %v62_v44  ;;  %v109_v62 = vmul.f32 %v92_v51, %v65_v47  ;;  %v112_v63 = vmul.f32 %v92_v51, %v68_v48 }
  0x49   :  { %v115_v6 = vmul.f32 %v92_v51, %v71_v49  ;;  %v94_v7 = vmul.f32 %v92_v51, %v50_v14  ;;  %v97_v8 = vmul.f32 %v92_v51, %v53_v15  ;;  %v100_v3 = vmul.f32 %v92_v51, %v56_v17 }
  0x4a   :  { %v104_v9 = vadd.f32 %v103_v60, %v102_v52  ;;  %v107_v11 = vadd.f32 %v106_v61, %v105_v53  ;;  %v110_v18 = vadd.f32 %v109_v62, %v108_v54  ;;  %v113_v0 = vadd.f32 %v112_v63, %v111_v55 }
  0x4b   :  { %v116_v1 = vadd.f32 %v115_v6, %v114_v56  ;;  %v118_v4 = vmul.f32 %v92_v51, %v74_v57  ;;  %v95_v22 = vadd.f32 %v94_v7, %v93_v58  ;;  %v98_v23 = vadd.f32 %v97_v8, %v96_v59 }
  0x4c   :  { %v127_v12 = vmul.f32 %v113_v0, %v107_v11  ;;  %v123_v21 = vmul.f32 %v113_v0, %v110_v18  ;;  %v598_v14 = vadd.f32 %v100_v3, %v99_v2 }
  0x4d   :  { %v126_v19 = vmul.f32 %v116_v1, %v104_v9  ;;  %v596_v13 = vadd.f32 %v118_v4, %v117_v10  ;;  %v121_v20 = vmul.f32 %v116_v1, %v110_v18  ;;  %v135_v41 = vmul.f32 %v113_v0, %v98_v23 }
  0x4e   :  { %v129_v36 = vmul.f32 %v116_v1, %v598_v14  ;;  %v133_v37 = vmul.f32 %v113_v0, %v598_v14  ;;  %v141_v38 = vmul.f32 %v104_v9, %v598_v14  ;;  %v136_v42 = vmul.f32 %v116_v1, %v95_v22 }
  0x4f   :  { %v120_v15 = vmul.f32 %v596_v13, %v107_v11  ;;  %v124_v5 = vmul.f32 %v596_v13, %v104_v9  ;;  %v128_v24 = vsub.f32 %v126_v19, %v127_v12  ;;  %v130_v40 = vmul.f32 %v596_v13, %v98_v23 }
  0x50   :  { %v138_v43 = vmul.f32 %v110_v18, %v98_v23  ;;  %v132_v44 = vmul.f32 %v596_v13, %v95_v22  ;;  %v139_v45 = vmul.f32 %v107_v11, %v598_v14  ;;  %v142_v46 = vmul.f32 %v110_v18, %v95_v22 }
  0x51   :  { %v122_v25 = vsub.f32 %v120_v15, %v121_v20  ;;  %v125_v26 = vsub.f32 %v123_v21, %v124_v5  ;;  %v150_v27 = vmul.f32 %v128_v24, %v598_v14  ;;  %v131_v50 = vsub.f32 %v129_v36, %v130_v40 }
  0x52   :  { %v137_v51 = vsub.f32 %v135_v41, %v136_v42  ;;  %v144_v52 = vmul.f32 %v107_v11, %v95_v22  ;;  %v145_v53 = vmul.f32 %v104_v9, %v98_v23  ;;  %v134_v54 = vsub.f32 %v132_v44, %v133_v37 }
  0x53   :  { %v147_v16 = vmul.f32 %v122_v25, %v95_v22  ;;  %v148_v17 = vmul.f32 %v125_v26, %v98_v23  ;;  %v140_v55 = vsub.f32 %v138_v43, %v139_v45  ;;  %v143_v56 = vsub.f32 %v141_v38, %v142_v46 }
  0x54   :  { %v146_v6 = vsub.f32 %v144_v52, %v145_v53 }
  0x55   :  { %v149_v28 = vadd.f32 %v148_v17, %v147_v16 }
  0x57   :  { %v151_v29 = vadd.f32 %v150_v27, %v149_v28 }
  0x59   :  { %v152_v30 = vand.u32 2147483647, %v151_v29  ;;  %vm160_vm1 = vcmp.lt.f32.partialorder %v151_v29, 0.0 }
  0x5b   :  { %v153_v31 = vmax.f32 %v152_v30, 1e-30 }
  0x5d   :  { %511 = vlog2.f32 %v153_v31 }
  0x6a   :  { %v512_v32 = vpop.eup %511 }
  0x6b   :  { %v155_v33 = vmul.f32 0.6931472, %v512_v32 }
  0x6d   :  { %v156_v34 = vmul.f32 -0.33333334, %v155_v33 }
  0x6f   :  { %v157_v35 = vmul.f32 1.442695, %v156_v34 }
  0x71   :  { %513 = vpow2.f32 %v157_v35 }
  0x7e   :  { %v514_v39 = vpop.eup %513 }
  0x7f   :  { %v159_v47 = vmul.f32 %v514_v39, %v514_v39  ;;  %v163_v48 = vmul.f32 0.5, %v514_v39 }
  0x81   :  { %v161_v49 = vsub.f32 0.0, %v159_v47  ;;  %v174_v59 = vmul.f32 %v163_v48, %v104_v9  ;;  %v177_v60 = vmul.f32 %v163_v48, %v107_v11  ;;  %v180_v61 = vmul.f32 %v163_v48, %v110_v18 }
  0x82   :  { %v183_v62 = vmul.f32 %v163_v48, %v113_v0  ;;  %v186_v63 = vmul.f32 %v163_v48, %v116_v1  ;;  %v165_v7 = vmul.f32 %v163_v48, %v95_v22  ;;  %v168_v8 = vmul.f32 %v163_v48, %v98_v23 }
  0x83   :  { %v162_v57 = vsel %vm160_vm1, %v161_v49, %v159_v47  ;;  %v189_v15 = vmul.f32 %v163_v48, %v596_v13  ;;  %v171_v18 = vmul.f32 %v163_v48, %v598_v14 }
  0x84   :  { %v164_v58 = vmul.f32 0.5, %v162_v57 }
  0x86   :  { %v175_v10 = vmul.f32 %v164_v58, %v131_v50  ;;  %v178_v2 = vmul.f32 %v164_v58, %v134_v54  ;;  %v181_v3 = vmul.f32 %v164_v58, %v137_v51  ;;  %v184_v4 = vmul.f32 %v164_v58, %v140_v55 }
  0x87   :  { %v187_v19 = vmul.f32 %v164_v58, %v143_v56  ;;  %v166_v12 = vmul.f32 %v164_v58, %v122_v25  ;;  %v169_v20 = vmul.f32 %v164_v58, %v125_v26  ;;  %v172_v0 = vmul.f32 %v164_v58, %v128_v24 }
  0x88   :  { %v176_v21 = vadd.f32 %v175_v10, %v174_v59  ;;  %v179_v5 = vadd.f32 %v178_v2, %v177_v60  ;;  %v182_v16 = vadd.f32 %v181_v3, %v180_v61  ;;  %v185_v9 = vadd.f32 %v184_v4, %v183_v62 }
  0x89   :  { %v188_v11 = vadd.f32 %v187_v19, %v186_v63  ;;  %v190_v1 = vmul.f32 %v164_v58, %v146_v6  ;;  %v167_v29 = vadd.f32 %v166_v12, %v165_v7  ;;  %v170_v25 = vadd.f32 %v169_v20, %v168_v8 }
  0x8a   :  { %v199_v23 = vmul.f32 %v185_v9, %v179_v5  ;;  %v195_v28 = vmul.f32 %v185_v9, %v182_v16  ;;  %v613_v26 = vadd.f32 %v172_v0, %v171_v18 }
  0x8b   :  { %v198_v22 = vmul.f32 %v188_v11, %v176_v21  ;;  %v611_v17 = vadd.f32 %v190_v1, %v189_v15  ;;  %v193_v27 = vmul.f32 %v188_v11, %v182_v16  ;;  %v207_v48 = vmul.f32 %v185_v9, %v170_v25 }
  0x8c   :  { %v201_v43 = vmul.f32 %v188_v11, %v613_v26  ;;  %v205_v44 = vmul.f32 %v185_v9, %v613_v26  ;;  %v213_v45 = vmul.f32 %v176_v21, %v613_v26  ;;  %v208_v49 = vmul.f32 %v188_v11, %v167_v29 }
  0x8d   :  { %v192_v13 = vmul.f32 %v611_v17, %v179_v5  ;;  %v196_v30 = vmul.f32 %v611_v17, %v176_v21  ;;  %v200_v31 = vsub.f32 %v198_v22, %v199_v23  ;;  %v202_v47 = vmul.f32 %v611_v17, %v170_v25 }
  0x8e   :  { %v210_v50 = vmul.f32 %v182_v16, %v170_v25  ;;  %v204_v51 = vmul.f32 %v611_v17, %v167_v29  ;;  %v211_v52 = vmul.f32 %v179_v5, %v613_v26  ;;  %v214_v53 = vmul.f32 %v182_v16, %v167_v29 }
  0x8f   :  { %v194_v32 = vsub.f32 %v192_v13, %v193_v27  ;;  %v197_v33 = vsub.f32 %v195_v28, %v196_v30  ;;  %v222_v34 = vmul.f32 %v200_v31, %v613_v26  ;;  %v203_v57 = vsub.f32 %v201_v43, %v202_v47 }
  0x90   :  { %v209_v58 = vsub.f32 %v207_v48, %v208_v49  ;;  %v216_v59 = vmul.f32 %v179_v5, %v167_v29  ;;  %v217_v60 = vmul.f32 %v176_v21, %v170_v25  ;;  %v206_v61 = vsub.f32 %v204_v51, %v205_v44 }
  0x91   :  { %v219_v14 = vmul.f32 %v194_v32, %v167_v29  ;;  %v220_v24 = vmul.f32 %v197_v33, %v170_v25  ;;  %v212_v62 = vsub.f32 %v210_v50, %v211_v52  ;;  %v215_v63 = vsub.f32 %v213_v45, %v214_v53 }
  0x92   :  { %v218_v19 = vsub.f32 %v216_v59, %v217_v60 }
  0x93   :  { %v221_v35 = vadd.f32 %v220_v24, %v219_v14 }
  0x95   :  { %v223_v36 = vadd.f32 %v222_v34, %v221_v35 }
  0x97   :  { %v224_v37 = vand.u32 2147483647, %v223_v36  ;;  %vm232_vm2 = vcmp.lt.f32.partialorder %v223_v36, 0.0 }
  0x99   :  { %v225_v38 = vmax.f32 %v224_v37, 1e-30 }
  0x9b   :  { %515 = vlog2.f32 %v225_v38 }
  0xa8   :  { %v516_v39 = vpop.eup %515 }
  0xa9   :  { %v227_v40 = vmul.f32 0.6931472, %v516_v39 }
  0xab   :  { %v228_v41 = vmul.f32 -0.33333334, %v227_v40 }
  0xad   :  { %v229_v42 = vmul.f32 1.442695, %v228_v41 }
  0xaf   :  { %517 = vpow2.f32 %v229_v42 }
  0xbc   :  { %v518_v46 = vpop.eup %517 }
  0xbd   :  { %v231_v54 = vmul.f32 %v518_v46, %v518_v46  ;;  %v235_v55 = vmul.f32 0.5, %v518_v46 }
  0xbf   :  { %v233_v56 = vsub.f32 0.0, %v231_v54  ;;  %v246_v8 = vmul.f32 %v235_v55, %v176_v21  ;;  %v249_v10 = vmul.f32 %v235_v55, %v179_v5  ;;  %v252_v2 = vmul.f32 %v235_v55, %v182_v16 }
  0xc0   :  { %v255_v3 = vmul.f32 %v235_v55, %v185_v9  ;;  %v258_v4 = vmul.f32 %v235_v55, %v188_v11  ;;  %v237_v12 = vmul.f32 %v235_v55, %v167_v29  ;;  %v240_v20 = vmul.f32 %v235_v55, %v170_v25 }
  0xc1   :  { %v234_v6 = vsel %vm232_vm2, %v233_v56, %v231_v54  ;;  %v261_v13 = vmul.f32 %v235_v55, %v611_v17  ;;  %v243_v16 = vmul.f32 %v235_v55, %v613_v26 }
  0xc2   :  { %v236_v7 = vmul.f32 0.5, %v234_v6 }
  0xc4   :  { %v247_v15 = vmul.f32 %v236_v7, %v203_v57  ;;  %v250_v18 = vmul.f32 %v236_v7, %v206_v61  ;;  %v253_v0 = vmul.f32 %v236_v7, %v209_v58  ;;  %v256_v1 = vmul.f32 %v236_v7, %v212_v62 }
  0xc5   :  { %v259_v22 = vmul.f32 %v236_v7, %v215_v63  ;;  %v238_v23 = vmul.f32 %v236_v7, %v194_v32  ;;  %v241_v27 = vmul.f32 %v236_v7, %v197_v33  ;;  %v244_v9 = vmul.f32 %v236_v7, %v200_v31 }
  0xc6   :  { %v248_v28 = vadd.f32 %v247_v15, %v246_v8  ;;  %v251_v30 = vadd.f32 %v250_v18, %v249_v10  ;;  %v254_v14 = vadd.f32 %v253_v0, %v252_v2  ;;  %v257_v21 = vadd.f32 %v256_v1, %v255_v3 }
  0xc7   :  { %v260_v5 = vadd.f32 %v259_v22, %v258_v4  ;;  %v262_v11 = vmul.f32 %v236_v7, %v218_v19  ;;  %v239_v36 = vadd.f32 %v238_v23, %v237_v12  ;;  %v242_v37 = vadd.f32 %v241_v27, %v240_v20 }
  0xc8   :  { %v271_v25 = vmul.f32 %v257_v21, %v251_v30  ;;  %v267_v35 = vmul.f32 %v257_v21, %v254_v14  ;;  %v245_v32 = vadd.f32 %v244_v9, %v243_v16 }
  0xc9   :  { %v270_v29 = vmul.f32 %v260_v5, %v248_v28  ;;  %v263_v24 = vadd.f32 %v262_v11, %v261_v13  ;;  %v265_v34 = vmul.f32 %v260_v5, %v254_v14  ;;  %v279_v48 = vmul.f32 %v257_v21, %v242_v37 }
  0xca   :  { %v273_v31 = vmul.f32 %v260_v5, %v245_v32  ;;  %v285_v45 = vmul.f32 %v248_v28, %v245_v32  ;;  %v277_v47 = vmul.f32 %v257_v21, %v245_v32  ;;  %v280_v49 = vmul.f32 %v260_v5, %v239_v36 }
  0xcb   :  { %v264_v33 = vmul.f32 %v263_v24, %v251_v30  ;;  %v268_v38 = vmul.f32 %v263_v24, %v248_v28  ;;  %v272_v39 = vsub.f32 %v270_v29, %v271_v25  ;;  %v274_v46 = vmul.f32 %v263_v24, %v242_v37 }
  0xcc   :  { %v276_v51 = vmul.f32 %v263_v24, %v239_v36  ;;  %v282_v52 = vmul.f32 %v254_v14, %v242_v37  ;;  %v283_v53 = vmul.f32 %v251_v30, %v245_v32  ;;  %v286_v54 = vmul.f32 %v254_v14, %v239_v36 }
  0xcd   :  { %v266_v17 = vsub.f32 %v264_v33, %v265_v34  ;;  %v269_v40 = vsub.f32 %v267_v35, %v268_v38  ;;  %v294_v43 = vmul.f32 %v272_v39, %v245_v32  ;;  %v275_v56 = vsub.f32 %v273_v31, %v274_v46 }
  0xce   :  { %v278_v58 = vsub.f32 %v276_v51, %v277_v47  ;;  %v281_v59 = vsub.f32 %v279_v48, %v280_v49  ;;  %v284_v60 = vsub.f32 %v282_v52, %v283_v53  ;;  %v287_v61 = vsub.f32 %v285_v45, %v286_v54 }
  0xcf   :  { %v291_v41 = vmul.f32 %v266_v17, %v239_v36  ;;  %v292_v42 = vmul.f32 %v269_v40, %v242_v37  ;;  %v288_v62 = vmul.f32 %v251_v30, %v239_v36  ;;  %v289_v63 = vmul.f32 %v248_v28, %v242_v37 }
  0xd1   :  { %v293_v44 = vadd.f32 %v292_v42, %v291_v41  ;;  %v290_v4 = vsub.f32 %v288_v62, %v289_v63 }
  0xd3   :  { %v295_v26 = vadd.f32 %v294_v43, %v293_v44 }
  0xd5   :  { %519 = vrcp.f32 %v295_v26 }
  0xe2   :  { %v520_v50 = vpop.eup %519 }
  0xe3   :  { %v297_v55 = vmul.f32 %v520_v50, %v295_v26 }
  0xe5   :  { %v298_v57 = vsub.f32 2.0, %v297_v55 }
  0xe7   :  { %v299_v6 = vmul.f32 %v520_v50, %v298_v57 }
  0xe9   :  { %v309_v7 = vmul.f32 %v299_v6, %v275_v56  ;;  %v312_v8 = vmul.f32 %v299_v6, %v278_v58  ;;  %v315_v10 = vmul.f32 %v299_v6, %v281_v59  ;;  %v318_v2 = vmul.f32 %v299_v6, %v284_v60 }
  0xea   :  { %v321_v3 = vmul.f32 %v299_v6, %v287_v61  ;;  %v300_v19 = vmul.f32 %v299_v6, %v266_v17  ;;  %v303_v12 = vmul.f32 %v299_v6, %v269_v40  ;;  %v306_v22 = vmul.f32 %v299_v6, %v272_v39 }
  0xeb   :  { %v310_v20 = vadd.f32 %v309_v7, %v248_v28  ;;  %v313_v15 = vadd.f32 %v312_v8, %v251_v30  ;;  %v316_v18 = vadd.f32 %v315_v10, %v254_v14  ;;  %v319_v0 = vadd.f32 %v318_v2, %v257_v21 }
  0xec   :  { %v322_v1 = vadd.f32 %v321_v3, %v260_v5  ;;  %v324_v11 = vmul.f32 %v299_v6, %v290_v4  ;;  %v301_v29 = vadd.f32 %v300_v19, %v239_v36  ;;  %v304_v25 = vadd.f32 %v303_v12, %v242_v37 }
  0xed   :  { %v311_v23 = vmul.f32 0.5, %v310_v20  ;;  %v314_v27 = vmul.f32 0.5, %v313_v15  ;;  %v317_v13 = vmul.f32 0.5, %v316_v18  ;;  %v320_v16 = vmul.f32 0.5, %v319_v0 }
  0xee   :  { %v323_v9 = vmul.f32 0.5, %v322_v1  ;;  %v307_v34 = vadd.f32 %v306_v22, %v245_v32  ;;  %v325_v35 = vadd.f32 %v324_v11, %v263_v24  ;;  %v302_v30 = vmul.f32 0.5, %v301_v29 }
  0xef   :  { %v334_v38 = vmul.f32 %v320_v16, %v314_v27  ;;  %v330_v28 = vmul.f32 %v320_v16, %v317_v13  ;;  %v305_v14 = vmul.f32 0.5, %v304_v25 }
  0xf0   :  { %v333_v33 = vmul.f32 %v323_v9, %v311_v23  ;;  %v326_v17 = vmul.f32 0.5, %v325_v35  ;;  %v328_v40 = vmul.f32 %v323_v9, %v317_v13  ;;  %v308_v21 = vmul.f32 0.5, %v307_v34 }
  0xf1   :  { %v342_v47 = vmul.f32 %v320_v16, %v305_v14  ;;  %v343_v48 = vmul.f32 %v323_v9, %v302_v30  ;;  %v345_v51 = vmul.f32 %v317_v13, %v305_v14  ;;  %v349_v53 = vmul.f32 %v317_v13, %v302_v30 }
  0xf2   :  { %v327_v5 = vmul.f32 %v326_v17, %v314_v27  ;;  %v331_v39 = vmul.f32 %v326_v17, %v311_v23  ;;  %v335_v41 = vsub.f32 %v333_v33, %v334_v38  ;;  %v336_v24 = vmul.f32 %v323_v9, %v308_v21 }
  0xf3   :  { %v348_v32 = vmul.f32 %v311_v23, %v308_v21  ;;  %v337_v45 = vmul.f32 %v326_v17, %v305_v14  ;;  %v340_v46 = vmul.f32 %v320_v16, %v308_v21  ;;  %v339_v50 = vmul.f32 %v326_v17, %v302_v30 }
  0xf4   :  { %v329_v42 = vsub.f32 %v327_v5, %v328_v40  ;;  %v332_v43 = vsub.f32 %v330_v28, %v331_v39  ;;  %v357_v31 = vmul.f32 %v335_v41, %v308_v21  ;;  %v346_v52 = vmul.f32 %v314_v27, %v308_v21 }
  0xf5   :  { %v338_v55 = vsub.f32 %v336_v24, %v337_v45  ;;  %v341_v57 = vsub.f32 %v339_v50, %v340_v46  ;;  %v344_v58 = vsub.f32 %v342_v47, %v343_v48  ;;  %v350_v60 = vsub.f32 %v348_v32, %v349_v53 }
  0xf6   :  { %v354_v44 = vmul.f32 %v329_v42, %v302_v30  ;;  %v355_v26 = vmul.f32 %v332_v43, %v305_v14  ;;  %v347_v59 = vsub.f32 %v345_v51, %v346_v52  ;;  %v351_v61 = vmul.f32 %v314_v27, %v302_v30 }
  0xf7   :  { %v352_v62 = vmul.f32 %v311_v23, %v305_v14 }
  0xf8   :  { %v356_v36 = vadd.f32 %v355_v26, %v354_v44 }
  0xf9   :  { %v353_v3 = vsub.f32 %v351_v61, %v352_v62 }
  0xfa   :  { %v358_v37 = vadd.f32 %v357_v31, %v356_v36 }
  0xfc   :  { %521 = vrcp.f32 %v358_v37 }
 0x109   :  { %v522_v49 = vpop.eup %521 }
 0x10a   :  { %v360_v54 = vmul.f32 %v522_v49, %v358_v37 }
 0x10c   :  { %v361_v56 = vsub.f32 2.0, %v360_v54 }
 0x10e   :  { %v362_v63 = vmul.f32 %v522_v49, %v361_v56 }
 0x110   :  { %v372_v6 = vmul.f32 %v362_v63, %v338_v55  ;;  %v375_v7 = vmul.f32 %v362_v63, %v341_v57  ;;  %v378_v8 = vmul.f32 %v362_v63, %v344_v58  ;;  %v381_v10 = vmul.f32 %v362_v63, %v347_v59 }
 0x111   :  { %v384_v2 = vmul.f32 %v362_v63, %v350_v60  ;;  %v363_v4 = vmul.f32 %v362_v63, %v329_v42  ;;  %v366_v19 = vmul.f32 %v362_v63, %v332_v43  ;;  %v369_v1 = vmul.f32 %v362_v63, %v335_v41 }
 0x112   :  { %v373_v12 = vadd.f32 %v372_v6, %v311_v23  ;;  %v376_v20 = vadd.f32 %v375_v7, %v314_v27  ;;  %v379_v15 = vadd.f32 %v378_v8, %v317_v13  ;;  %v382_v18 = vadd.f32 %v381_v10, %v320_v16 }
 0x113   :  { %v385_v0 = vadd.f32 %v384_v2, %v323_v9  ;;  %v387_v35 = vmul.f32 %v362_v63, %v353_v3  ;;  %v364_v33 = vadd.f32 %v363_v4, %v302_v30  ;;  %v367_v38 = vadd.f32 %v366_v19, %v305_v14 }
 0x114   :  { %v374_v22 = vmul.f32 0.5, %v373_v12  ;;  %v377_v11 = vmul.f32 0.5, %v376_v20  ;;  %v380_v29 = vmul.f32 0.5, %v379_v15  ;;  %v383_v25 = vmul.f32 0.5, %v382_v18 }
 0x115   :  { %v386_v34 = vmul.f32 0.5, %v385_v0  ;;  %v370_v40 = vadd.f32 %v369_v1, %v308_v21  ;;  %v388_v28 = vadd.f32 %v387_v35, %v326_v17  ;;  %v365_v13 = vmul.f32 0.5, %v364_v33 }
 0x116   :  { %v397_v39 = vmul.f32 %v383_v25, %v377_v11  ;;  %v393_v27 = vmul.f32 %v383_v25, %v380_v29  ;;  %v368_v16 = vmul.f32 0.5, %v367_v38 }
 0x117   :  { %v396_v5 = vmul.f32 %v386_v34, %v374_v22  ;;  %v626_v42 = vmul.f32 0.5, %v388_v28  ;;  %v391_v23 = vmul.f32 %v386_v34, %v380_v29  ;;  %v371_v9 = vmul.f32 0.5, %v370_v40 }
 0x118   :  { %v405_v46 = vmul.f32 %v383_v25, %v368_v16  ;;  %v406_v47 = vmul.f32 %v386_v34, %v365_v13  ;;  %v408_v50 = vmul.f32 %v380_v29, %v368_v16  ;;  %v412_v52 = vmul.f32 %v380_v29, %v365_v13 }
 0x119   :  { %v390_v41 = vmul.f32 %v626_v42, %v377_v11  ;;  %v394_v43 = vmul.f32 %v626_v42, %v374_v22  ;;  %v398_v44 = vsub.f32 %v396_v5, %v397_v39  ;;  %v399_v37 = vmul.f32 %v386_v34, %v371_v9 }
 0x11a   :  { %v411_v24 = vmul.f32 %v374_v22, %v371_v9  ;;  %v400_v32 = vmul.f32 %v626_v42, %v368_v16  ;;  %v403_v45 = vmul.f32 %v383_v25, %v371_v9  ;;  %v402_v49 = vmul.f32 %v626_v42, %v365_v13 }
 0x11b   :  { %v392_v26 = vsub.f32 %v390_v41, %v391_v23  ;;  %v395_v31 = vsub.f32 %v393_v27, %v394_v43  ;;  %v420_v21 = vmul.f32 %v398_v44, %v371_v9  ;;  %v409_v51 = vmul.f32 %v377_v11, %v371_v9 }
 0x11c   :  { %v414_v54 = vmul.f32 %v377_v11, %v365_v13  ;;  %v415_v55 = vmul.f32 %v374_v22, %v368_v16  ;;  %v401_v57 = vsub.f32 %v399_v37, %v400_v32  ;;  %v404_v58 = vsub.f32 %v402_v49, %v403_v45 }
 0x11d   :  { %v417_v30 = vmul.f32 %v392_v26, %v365_v13  ;;  %v418_v14 = vmul.f32 %v395_v31, %v368_v16  ;;  %v407_v59 = vsub.f32 %v405_v46, %v406_v47  ;;  %v410_v60 = vsub.f32 %v408_v50, %v409_v51 }
 0x11e   :  { %v413_v61 = vsub.f32 %v411_v24, %v412_v52  ;;  %v416_v63 = vsub.f32 %v414_v54, %v415_v55 }
 0x11f   :  { %v419_v17 = vadd.f32 %v418_v14, %v417_v30 }
 0x121   :  { %v421_v36 = vadd.f32 %v420_v21, %v419_v17 }
 0x123   :  { %523 = vrcp.f32 %v421_v36 }
 0x130   :  { %v524_v48 = vpop.eup %523 }
 0x131   :  { %v423_v53 = vmul.f32 %v524_v48, %v421_v36 }
 0x133   :  { %v424_v56 = vsub.f32 2.0, %v423_v53 }
 0x135   :  { %v425_v62 = vmul.f32 %v524_v48, %v424_v56 }
 0x137   :  { %v426_v6 = vmul.f32 %v425_v62, %v392_v26  ;;  %v429_v7 = vmul.f32 %v425_v62, %v395_v31  ;;  %v432_v8 = vmul.f32 %v425_v62, %v398_v44  ;;  %v435_v10 = vmul.f32 %v425_v62, %v401_v57 }
 0x138   :  { %v438_v2 = vmul.f32 %v425_v62, %v404_v58  ;;  %v441_v3 = vmul.f32 %v425_v62, %v407_v59  ;;  %v444_v4 = vmul.f32 %v425_v62, %v410_v60  ;;  %v447_v19 = vmul.f32 %v425_v62, %v413_v61 }
 0x139   :  { %v427_v12 = vadd.f32 %v426_v6, %v365_v13  ;;  %v430_v20 = vadd.f32 %v429_v7, %v368_v16  ;;  %v433_v15 = vadd.f32 %v432_v8, %v371_v9  ;;  %v436_v18 = vadd.f32 %v435_v10, %v374_v22 }
 0x13a   :  { %v439_v0 = vadd.f32 %v438_v2, %v377_v11  ;;  %v442_v1 = vadd.f32 %v441_v3, %v380_v29  ;;  %v445_v35 = vadd.f32 %v444_v4, %v383_v25  ;;  %v448_v33 = vadd.f32 %v447_v19, %v386_v34 }
 0x13b   :  { %v428_v38 = vmul.f32 0.5, %v427_v12  ;;  %v431_v40 = vmul.f32 0.5, %v430_v20  ;;  %v434_v28 = vmul.f32 0.5, %v433_v15  ;;  %v437_v5 = vmul.f32 0.5, %v436_v18 }
 0x13c   :  { %v440_v39 = vmul.f32 0.5, %v439_v0  ;;  %v443_v23 = vmul.f32 0.5, %v442_v1  ;;  %v446_v27 = vmul.f32 0.5, %v445_v35  ;;  %v449_v41 = vmul.f32 0.5, %v448_v33 }
 0x13d   :  { %453 = vst [vmem:[#allocation5] sm:$0xff] %v428_v38  ;;  %455 = vst [vmem:[#allocation5 + $0x8] sm:$0xff] %v431_v40  ;;  %v450_v13 = vmul.f32 %v425_v62, %v416_v63 }
 0x13e   :  { %457 = vst [vmem:[#allocation5 + $0x10] sm:$0xff] %v434_v28  ;;  %459 = vst [vmem:[#allocation5 + $0x18] sm:$0xff] %v437_v5 }
 0x13f   :  { %461 = vst [vmem:[#allocation5 + $0x20] sm:$0xff] %v440_v39  ;;  %463 = vst [vmem:[#allocation5 + $0x28] sm:$0xff] %v443_v23  ;;  %v451_v22 = vadd.f32 %v450_v13, %v626_v42 }
 0x140   :  { %465 = vst [vmem:[#allocation5 + $0x30] sm:$0xff] %v446_v27  ;;  %467 = vst [vmem:[#allocation5 + $0x38] sm:$0xff] %v449_v41 }
 0x141   :  { %v452_v11 = vmul.f32 0.5, %v451_v22 }
 0x143   :  { %469 = vst [vmem:[#allocation5 + $0x40] sm:$0xff] %v452_v11 }
 0x144   :  { %556 = shalt.err (!%p553_p9)
}
 0x145   :  { %481 = dma.vmem_to_hbm [thread:$0]  %s476_s13, 1152, %s640_s1, [#allocation4], %s570_s9, %s570_s9, %s571_s10  }
 0x146   :  { %567 = dma.done.wait [#allocation4], 1152  }
 0x147   :  { %568 = vsyncadd [#allocation4], 4294966144 }
 0x148   :  { %485 = vsyncpa [#allocation3], 1 }
 0x149   :  { %486 = vsyncpa [#allocation4], 1 }

</bundles_post_ra>
